<compile_context>
chip_gen: v5e
topology: v5e:2x2
jax: 0.10.0
libtpu: 0.0.40
codegen_flags: <defaults>
</compile_context>

<pallas_src>
import functools
import math

import jax
import jax.numpy as jnp
from jax.experimental import pallas as pl
from jax.experimental.pallas import tpu as pltpu

LN_EPS = 1e-5


def _round_up(v, m):
    return (v + m - 1) // m * m


def _silu(v):
    return v * jax.nn.sigmoid(v)


def _pick_batch_tile(batch, in_f, out_pad, max_tile,
                     budget_bytes=16 * 1024 * 1024):
    """Batch tile: multiple of 16 (bf16 sublane packing), sized for VMEM budget."""
    tb = min(max_tile, _round_up(batch, 16))
    tb = max(16, _round_up(tb, 16))
    # Double-buffered activation blocks (x tile + output tile) must fit the budget.
    while tb > 16 and 2 * 4 * (tb * in_f + tb * out_pad) > budget_bytes:
        tb = max(16, _round_up(tb // 2, 16))
    return tb


def kaln_kernel(stats_ref, x_ref, w_ref, bias_ref, lnw_ref, lnb_ref, o_ref,
                *, out_features, degree):
    """Fused KALN forward for one batch tile.

    stats_ref : SMEM (2,) f32   -> [x_min, 2/(x_max - x_min)] (global, from wrapper)
    x_ref     : VMEM (TB, in) f32
    w_ref     : VMEM (in*(degree+1), out_pad)   rows = [base.T | P1 | ... | P_degree]
    bias_ref  : VMEM (1, out_pad) f32           P0 (all-ones) contribution
    lnw_ref   : VMEM (1, out_pad) f32
    lnb_ref   : VMEM (1, out_pad) f32
    o_ref     : VMEM (TB, out_pad)
    """
    x = x_ref[...].astype(jnp.float32)

    # Normalization to [-1, 1] with GLOBAL min/max (scalars from SMEM).
    x_min = stats_ref[0]
    scale = stats_ref[1]
    xn = (x - x_min) * scale - 1.0

    # Build the fused MXU operand: [SiLU(x), P1, ..., P_degree]  (f32 on the VPU).
    parts = [_silu(x)]
    p_prev = jnp.ones_like(xn)        # P0 (folded into bias_ref; no matmul needed)
    p_curr = xn                       # P1
    parts.append(p_curr)
    for n in range(1, degree):
        c1 = (2.0 * n + 1.0) / (n + 1.0)   # hoisted Python constants: no vector divide
        c2 = n / (n + 1.0)
        p_next = c1 * xn * p_curr - c2 * p_prev
        parts.append(p_next)
        p_prev, p_curr = p_curr, p_next
    operand = jnp.concatenate(parts, axis=-1).astype(w_ref.dtype)

    # Single lane-dense MXU matmul (base + all Legendre orders), f32 accumulation.
    y = jnp.dot(operand, w_ref[...], preferred_element_type=jnp.float32)
    y = y + bias_ref[...]

    # LayerNorm over the real out_features. Padded columns of y are exactly zero
    # (zero-padded weights & bias), so sums over the padded width are exact.
    inv_n = 1.0 / out_features
    mean = jnp.sum(y, axis=-1, keepdims=True) * inv_n
    mean_sq = jnp.sum(y * y, axis=-1, keepdims=True) * inv_n
    var = mean_sq - mean * mean
    y = (y - mean) * jax.lax.rsqrt(var + LN_EPS)
    y = y * lnw_ref[...] + lnb_ref[...]

    # Final SiLU, lane-dense store (out_pad is a multiple of 128).
    o_ref[...] = _silu(y).astype(o_ref.dtype)


def kaln_forward(x, base_weight, poly_weight, ln_weight, ln_bias,
                 degree=3, mxu_dtype=jnp.bfloat16, max_batch_tile=512):
    batch, in_f = x.shape
    out_f = base_weight.shape[0]
    assert poly_weight.shape == (out_f, in_f * (degree + 1))

    out_pad = _round_up(out_f, 128)          # lane-dense output stores
    k_dim = in_f * (degree + 1)              # fused contraction dim (128 for the test)
    pad_o = out_pad - out_f

    # ---- weight prep (pure glue, outside the kernel) ----
    pw = poly_weight.reshape(out_f, in_f, degree + 1)       # [out, feature, order]
    pw_io = jnp.transpose(pw, (2, 1, 0))                    # (degree+1, in, out)
    p0_bias = jnp.sum(pw_io[0], axis=0)                     # P0 == 1 -> constant bias
    w_stack = jnp.concatenate(
        [base_weight.T] + [pw_io[j] for j in range(1, degree + 1)], axis=0)  # (K, out)

    w_stack = jnp.pad(w_stack, ((0, 0), (0, pad_o))).astype(mxu_dtype)
    p0_bias = jnp.pad(p0_bias, (0, pad_o)).reshape(1, out_pad).astype(jnp.float32)
    lnw = jnp.pad(ln_weight, (0, pad_o)).reshape(1, out_pad).astype(jnp.float32)
    lnb = jnp.pad(ln_bias, (0, pad_o)).reshape(1, out_pad).astype(jnp.float32)

    # ---- global min/max over the ORIGINAL tensor (preserves PyTorch semantics) ----
    x_f32 = x.astype(jnp.float32)
    x_min = jnp.min(x_f32)
    x_max = jnp.max(x_f32)
    stats = jnp.stack([x_min, 2.0 / (x_max - x_min)])        # SMEM scalars

    # ---- batch tiling ----
    tb = _pick_batch_tile(batch, in_f, out_pad, max_batch_tile)
    b_pad = _round_up(batch, tb)
    xp = jnp.pad(x_f32, ((0, b_pad - batch), (0, 0)))
    grid = (b_pad // tb,)

    # VMEM budget: 2x-buffered x/out blocks + resident weights, with margin.
    itemsize_w = jnp.dtype(mxu_dtype).itemsize
    est = 4 * 2 * tb * (in_f + out_pad) + 2 * k_dim * out_pad * itemsize_w
    vmem_limit = int(min(48 * 1024 * 1024, max(4 * 1024 * 1024, 2 * est)))

    kernel = functools.partial(kaln_kernel, out_features=out_f, degree=degree)

    out = pl.pallas_call(
        kernel,
        out_shape=jax.ShapeDtypeStruct((b_pad, out_pad), x.dtype),
        grid=grid,
        in_specs=[
            pl.BlockSpec(memory_space=pltpu.MemorySpace.SMEM),     # global min / scale
            pl.BlockSpec((tb, in_f), lambda i: (i, 0)),            # x tile
            pl.BlockSpec((k_dim, out_pad), lambda i: (0, 0)),      # fused weight (resident)
            pl.BlockSpec((1, out_pad), lambda i: (0, 0)),          # P0 bias
            pl.BlockSpec((1, out_pad), lambda i: (0, 0)),          # LN weight
            pl.BlockSpec((1, out_pad), lambda i: (0, 0)),          # LN bias
        ],
        out_specs=pl.BlockSpec((tb, out_pad), lambda i: (i, 0)),
        compiler_params=pltpu.CompilerParams(
            dimension_semantics=("parallel",),
            vmem_limit_bytes=vmem_limit,
        ),
    )(stats, xp, w_stack, p0_bias, lnw, lnb)

    return out[:batch, :out_f]


def kaln_reference(x, base_weight, poly_weight, ln_weight, ln_bias, degree=3):
    """Pure-JAX f32 reference mirroring the PyTorch forward."""
    base = _silu(x) @ base_weight.T
    xn = 2.0 * (x - x.min()) / (x.max() - x.min()) - 1.0
    polys = [jnp.ones_like(xn), xn]
    for n in range(1, degree):
        polys.append(((2.0 * n + 1.0) * xn * polys[-1] - n * polys[-2]) / (n + 1.0))
    basis = jnp.stack(polys, axis=-1).reshape(x.shape[0], -1)
    poly = basis @ poly_weight.T
    y = base + poly
    mean = jnp.mean(y, axis=-1, keepdims=True)
    var = jnp.mean((y - mean) ** 2, axis=-1, keepdims=True)
    y = (y - mean) / jnp.sqrt(var + LN_EPS)
    y = y * ln_weight + ln_bias
    return _silu(y)


if __name__ == "__main__":
    batch = 8
    input_features = 32
    output_features = 64
    degree = 3

    key = jax.random.PRNGKey(0)
    kx, kb, kp = jax.random.split(key, 3)

    # kaiming_uniform_ with nonlinearity='linear': bound = sqrt(3 / fan_in)
    x = jax.random.normal(kx, (batch, input_features), dtype=jnp.float32)
    b_bound = math.sqrt(3.0 / input_features)
    base_weight = jax.random.uniform(
        kb, (output_features, input_features), jnp.float32, -b_bound, b_bound)
    p_fan_in = input_features * (degree + 1)
    p_bound = math.sqrt(3.0 / p_fan_in)
    poly_weight = jax.random.uniform(
        kp, (output_features, p_fan_in), jnp.float32, -p_bound, p_bound)
    ln_weight = jnp.ones((output_features,), jnp.float32)
    ln_bias = jnp.zeros((output_features,), jnp.float32)

    ref = kaln_reference(x, base_weight, poly_weight, ln_weight, ln_bias, degree)

    # 1) f32-MXU path: tight match against the PyTorch-equivalent reference.
    out_f32 = jax.block_until_ready(
        kaln_forward(x, base_weight, poly_weight, ln_weight, ln_bias,
                     degree=degree, mxu_dtype=jnp.float32))
    assert out_f32.shape == (batch, output_features)
    assert jnp.allclose(out_f32, ref, atol=1e-4, rtol=1e-4), "f32 kernel mismatch"

    # 2) default bf16-MXU path (f32 accumulation): looser tolerance.
    out_bf16 = jax.block_until_ready(
        kaln_forward(x, base_weight, poly_weight, ln_weight, ln_bias, degree=degree))
    assert jnp.allclose(out_bf16, ref, atol=5e-2, rtol=5e-2), "bf16 kernel mismatch"

    # 3) multi-tile grid with ragged batch (exercises pipelining + padding).
    x_big = jax.random.normal(jax.random.PRNGKey(1), (200, input_features), jnp.float32)
    ref_big = kaln_reference(x_big, base_weight, poly_weight, ln_weight, ln_bias, degree)
    out_big = jax.block_until_ready(
        kaln_forward(x_big, base_weight, poly_weight, ln_weight, ln_bias,
                     degree=degree, max_batch_tile=64))
    assert out_big.shape == (200, output_features)
    assert jnp.allclose(out_big, ref_big, atol=5e-2, rtol=5e-2), "gridded kernel mismatch"

    print("KERNEL_OK")
</pallas_src>

<mosaic_0001>
module attributes {stable_mosaic.version = 11 : i64} {
  func.func @kaln_kernel(%arg0: i32, %arg1: memref<2xf32, #tpu.memory_space<smem>>, %arg2: memref<16x32xf32, #tpu.memory_space<vmem>>, %arg3: memref<128x128xf32, #tpu.memory_space<vmem>>, %arg4: memref<1x128xf32, #tpu.memory_space<vmem>>, %arg5: memref<1x128xf32, #tpu.memory_space<vmem>>, %arg6: memref<1x128xf32, #tpu.memory_space<vmem>>, %arg7: memref<16x128xf32, #tpu.memory_space<vmem>>) attributes {dimension_semantics = [#tpu.dimension_semantics<parallel>], iteration_bounds = array<i64: 1>, scalar_prefetch = 0 : i64, scratch_operands = 0 : i64, tpu.core_type = #tpu.core_type<tc>, window_params = [{transform_indices = @transform_0, window_bounds = array<i64: 2>}, {transform_indices = @transform_1, window_bounds = array<i64: 16, 32>}, {pipeline_mode = #tpu.pipeline_mode<synchronous>, transform_indices = @transform_2, window_bounds = array<i64: 128, 128>}, {pipeline_mode = #tpu.pipeline_mode<synchronous>, transform_indices = @transform_3, window_bounds = array<i64: 1, 128>}, {pipeline_mode = #tpu.pipeline_mode<synchronous>, transform_indices = @transform_4, window_bounds = array<i64: 1, 128>}, {pipeline_mode = #tpu.pipeline_mode<synchronous>, transform_indices = @transform_5, window_bounds = array<i64: 1, 128>}, {transform_indices = @transform_6, window_bounds = array<i64: 16, 128>}]} {
    %c0 = arith.constant 0 : index
    %c0_0 = arith.constant 0 : index
    %0 = vector.load %arg2[%c0, %c0_0] : memref<16x32xf32, #tpu.memory_space<vmem>>, vector<16x32xf32>
    %c0_1 = arith.constant 0 : index
    %1 = memref.load %arg1[%c0_1] : memref<2xf32, #tpu.memory_space<smem>>
    %c1 = arith.constant 1 : index
    %2 = memref.load %arg1[%c1] : memref<2xf32, #tpu.memory_space<smem>>
    %3 = vector.broadcast %1 : f32 to vector<16x32xf32>
    %4 = arith.subf %0, %3 : vector<16x32xf32>
    %5 = vector.broadcast %2 : f32 to vector<16x32xf32>
    %6 = arith.mulf %4, %5 : vector<16x32xf32>
    %cst = arith.constant 1.000000e+00 : f32
    %7 = vector.broadcast %cst : f32 to vector<16x32xf32>
    %8 = arith.subf %6, %7 : vector<16x32xf32>
    %9 = arith.negf %0 : vector<16x32xf32>
    %10 = math.exp %9 : vector<16x32xf32>
    %cst_2 = arith.constant 1.000000e+00 : f32
    %11 = vector.broadcast %cst_2 : f32 to vector<16x32xf32>
    %12 = arith.addf %11, %10 : vector<16x32xf32>
    %13 = arith.divf %11, %12 : vector<16x32xf32>
    %14 = arith.mulf %0, %13 : vector<16x32xf32>
    %cst_3 = arith.constant 1.000000e+00 : f32
    %15 = vector.broadcast %cst_3 : f32 to vector<16x32xf32>
    %cst_4 = arith.constant 1.500000e+00 : f32
    %16 = vector.broadcast %cst_4 : f32 to vector<16x32xf32>
    %17 = arith.mulf %16, %8 : vector<16x32xf32>
    %18 = arith.mulf %17, %8 : vector<16x32xf32>
    %cst_5 = arith.constant 5.000000e-01 : f32
    %19 = vector.broadcast %cst_5 : f32 to vector<16x32xf32>
    %20 = arith.mulf %19, %15 : vector<16x32xf32>
    %21 = arith.subf %18, %20 : vector<16x32xf32>
    %cst_6 = arith.constant 1.66666663 : f32
    %22 = vector.broadcast %cst_6 : f32 to vector<16x32xf32>
    %23 = arith.mulf %22, %8 : vector<16x32xf32>
    %24 = arith.mulf %23, %21 : vector<16x32xf32>
    %cst_7 = arith.constant 0.666666686 : f32
    %25 = vector.broadcast %cst_7 : f32 to vector<16x32xf32>
    %26 = arith.mulf %25, %8 : vector<16x32xf32>
    %27 = arith.subf %24, %26 : vector<16x32xf32>
    %28 = tpu.concatenate %14, %8, %21, %27 in 1 : vector<16x32xf32>, vector<16x32xf32>, vector<16x32xf32>, vector<16x32xf32> -> vector<16x128xf32>
    %c0_8 = arith.constant 0 : index
    %c0_9 = arith.constant 0 : index
    %29 = vector.load %arg3[%c0_8, %c0_9] : memref<128x128xf32, #tpu.memory_space<vmem>>, vector<128x128xf32>
    %cst_10 = arith.constant dense<0.000000e+00> : vector<16x128xf32>
    %30 = tpu.matmul %28, %29, %cst_10 {dimension_numbers = #tpu.dot_dimension_numbers<[1], [0], [0], [1], [0, 0, 1, 1], [], []>} : vector<16x128xf32>, vector<128x128xf32>, vector<16x128xf32> -> vector<16x128xf32>
    %c0_11 = arith.constant 0 : index
    %c0_12 = arith.constant 0 : index
    %31 = vector.load %arg4[%c0_11, %c0_12] : memref<1x128xf32, #tpu.memory_space<vmem>>, vector<1x128xf32>
    %32 = vector.broadcast %31 : vector<1x128xf32> to vector<16x128xf32>
    %33 = arith.addf %30, %32 : vector<16x128xf32>
    %cst_13 = arith.constant dense<0.000000e+00> : vector<16xf32>
    %34 = vector.multi_reduction <add>, %33, %cst_13 [1] : vector<16x128xf32> to vector<16xf32>
    %35 = vector.shape_cast %34 : vector<16xf32> to vector<16x1xf32>
    %cst_14 = arith.constant 1.562500e-02 : f32
    %36 = vector.broadcast %cst_14 : f32 to vector<16x1xf32>
    %37 = arith.mulf %35, %36 : vector<16x1xf32>
    %38 = arith.mulf %33, %33 : vector<16x128xf32>
    %cst_15 = arith.constant dense<0.000000e+00> : vector<16xf32>
    %39 = vector.multi_reduction <add>, %38, %cst_15 [1] : vector<16x128xf32> to vector<16xf32>
    %40 = vector.shape_cast %39 : vector<16xf32> to vector<16x1xf32>
    %cst_16 = arith.constant 1.562500e-02 : f32
    %41 = vector.broadcast %cst_16 : f32 to vector<16x1xf32>
    %42 = arith.mulf %40, %41 : vector<16x1xf32>
    %43 = arith.mulf %37, %37 : vector<16x1xf32>
    %44 = arith.subf %42, %43 : vector<16x1xf32>
    %45 = vector.broadcast %37 : vector<16x1xf32> to vector<16x128xf32>
    %46 = arith.subf %33, %45 : vector<16x128xf32>
    %cst_17 = arith.constant 9.99999974E-6 : f32
    %47 = vector.broadcast %cst_17 : f32 to vector<16x1xf32>
    %48 = arith.addf %44, %47 : vector<16x1xf32>
    %49 = math.rsqrt %48 : vector<16x1xf32>
    %50 = vector.broadcast %49 : vector<16x1xf32> to vector<16x128xf32>
    %51 = arith.mulf %46, %50 : vector<16x128xf32>
    %c0_18 = arith.constant 0 : index
    %c0_19 = arith.constant 0 : index
    %52 = vector.load %arg5[%c0_18, %c0_19] : memref<1x128xf32, #tpu.memory_space<vmem>>, vector<1x128xf32>
    %53 = vector.broadcast %52 : vector<1x128xf32> to vector<16x128xf32>
    %54 = arith.mulf %51, %53 : vector<16x128xf32>
    %c0_20 = arith.constant 0 : index
    %c0_21 = arith.constant 0 : index
    %55 = vector.load %arg6[%c0_20, %c0_21] : memref<1x128xf32, #tpu.memory_space<vmem>>, vector<1x128xf32>
    %56 = vector.broadcast %55 : vector<1x128xf32> to vector<16x128xf32>
    %57 = arith.addf %54, %56 : vector<16x128xf32>
    %58 = arith.negf %57 : vector<16x128xf32>
    %59 = math.exp %58 : vector<16x128xf32>
    %cst_22 = arith.constant 1.000000e+00 : f32
    %60 = vector.broadcast %cst_22 : f32 to vector<16x128xf32>
    %61 = arith.addf %60, %59 : vector<16x128xf32>
    %62 = arith.divf %60, %61 : vector<16x128xf32>
    %63 = arith.mulf %57, %62 : vector<16x128xf32>
    %c0_23 = arith.constant 0 : index
    %c0_24 = arith.constant 0 : index
    %64 = vector.load %arg7[%c0_23, %c0_24] : memref<16x128xf32, #tpu.memory_space<vmem>>, vector<16x128xf32>
    tpu.vector_store %arg7[%c0_23, %c0_24], %63 {strides = array<i32>} : memref<16x128xf32, #tpu.memory_space<vmem>>, vector<16x128xf32>,
    return
  }
  func.func @transform_0(%arg0: i32) -> i32 {
    %c0_i32 = arith.constant 0 : i32
    %c0_i32_0 = arith.constant 0 : i32
    return %c0_i32 : i32
  }
  func.func @transform_1(%arg0: i32) -> (i32, i32) {
    %c0_i32 = arith.constant 0 : i32
    %c0_i32_0 = arith.constant 0 : i32
    return %arg0, %c0_i32 : i32, i32
  }
  func.func @transform_2(%arg0: i32) -> (i32, i32) {
    %c0_i32 = arith.constant 0 : i32
    %c0_i32_0 = arith.constant 0 : i32
    %c0_i32_1 = arith.constant 0 : i32
    return %c0_i32, %c0_i32_0 : i32, i32
  }
  func.func @transform_3(%arg0: i32) -> (i32, i32) {
    %c0_i32 = arith.constant 0 : i32
    %c0_i32_0 = arith.constant 0 : i32
    %c0_i32_1 = arith.constant 0 : i32
    return %c0_i32, %c0_i32_0 : i32, i32
  }
  func.func @transform_4(%arg0: i32) -> (i32, i32) {
    %c0_i32 = arith.constant 0 : i32
    %c0_i32_0 = arith.constant 0 : i32
    %c0_i32_1 = arith.constant 0 : i32
    return %c0_i32, %c0_i32_0 : i32, i32
  }
  func.func @transform_5(%arg0: i32) -> (i32, i32) {
    %c0_i32 = arith.constant 0 : i32
    %c0_i32_0 = arith.constant 0 : i32
    %c0_i32_1 = arith.constant 0 : i32
    return %c0_i32, %c0_i32_0 : i32, i32
  }
  func.func @transform_6(%arg0: i32) -> (i32, i32) {
    %c0_i32 = arith.constant 0 : i32
    %c0_i32_0 = arith.constant 0 : i32
    return %arg0, %c0_i32 : i32, i32
  }
}

</mosaic_0001>

<bundles_post_ra>
// kernel: tpu_custom_call.1
= control target key start
LH: loop header
LB: loop body
LE: loop exit
PB: predicated region body
PF: predicated region fallthrough
CT: control target
= control target key end

     0   :  { %11 = vsyncpa [#allocation5], 0  ;;  %s578_s0 = inlined_call_operand.hbm [shape: f32[2], index: 0, kind: input, shape index: {}]   ;;  %s579_s1 = inlined_call_operand.hbm [shape: f32[16,32], index: 1, kind: input, shape index: {}]   ;;  %s580_s2 = inlined_call_operand.hbm [shape: f32[128,128], index: 2, kind: input, shape index: {}]   ;;  %s581_s3 = inlined_call_operand.vmem [shape: f32[1,128], index: 3, kind: input, shape index: {}]   ;;  %s582_s4 = inlined_call_operand.vmem [shape: f32[1,128], index: 4, kind: input, shape index: {}]   ;;  %s583_s5 = inlined_call_operand.vmem [shape: f32[1,128], index: 5, kind: input, shape index: {}]   ;;  %s584_s6 = inlined_call_operand.hbm [shape: f32[16,128], index: 6, kind: output, shape index: {}]  }
   0x1   :  { %12 = vsyncpa [#allocation3], 0 }
   0x2   :  { %13 = vsyncpa [#allocation8], 0 }
   0x3   :  { %14 = vsyncpa [#allocation4], 0  ;;  %s20_s23 = sshll.u32 %s578_s0, 4  ;;  %s28_s26 = sshll.u32 %s579_s1, 4  ;;  %s21_s23 = int_to_ptr.hbm [resolvable:$true] %s20_s23  ;;  %s29_s26 = int_to_ptr.hbm [resolvable:$true] %s28_s26 }
   0x4   :  { %s494_s27 = smov [#allocation2]   ;;  %s495_s28 = smov [#allocation6]  }
   0x5   :  { %23 = dma.hbm_to_smem %s21_s23, 16, %s494_s27, [#allocation5]  }
   0x6   :  { %s30_s29 = sshll.u32 %s495_s28, 4  ;;  %s496_s30 = smov 128   ;;  %s31_s29 = int_to_ptr.vmem [resolvable:$true] %s30_s29 }
   0x7   :  { %s497_s7 = smov 8   ;;  %s41_s0 = sshll.u32 %s580_s2, 4  ;;  %s42_s0 = int_to_ptr.hbm [resolvable:$true] %s41_s0 }
   0x8   :  { %36 = dma.hbm_to_vmem [thread:$0]  %s29_s26, 256, %s31_s29, [#allocation3], %s496_s30, %s496_s30, %s497_s7  }
   0x9   :  { %s498_s10 = smov [#allocation7]  }
   0xa   :  { %s43_s11 = sshll.u32 %s498_s10, 4  ;;  %s44_s11 = int_to_ptr.vmem [resolvable:$true] %s43_s11 }
   0xb   :  { %49 = dma.hbm_to_vmem [thread:$0]  %s42_s0, 2048, %s44_s11, [#allocation8], %s496_s30, %s496_s30, %s497_s7  }
   0xc   :  { %486 = dma.done.wait [#allocation5], 16  }
   0xd   :  { %487 = vsyncadd [#allocation5], 4294967280 }
   0xe   :  { %488 = dma.done.wait [#allocation3], 256  }
   0xf   :  { %489 = vsyncadd [#allocation3], 4294967040 }
  0x10   :  { %490 = dma.done.wait [#allocation8], 2048  }
  0x11   :  { %491 = vsyncadd [#allocation8], 4294965248 }
  0x12   :  { %68 = sfence }
  0x13   :  { %s71_s1 = sld [smem:[#allocation2]]  ;;  %v183_v0 = vld [vmem:[#allocation7 + $0x78] sm:$0xff]  ;;  %v182_v1 = vld [vmem:[#allocation7 + $0x70] sm:$0xff]  ;;  %v181_v2 = vld [vmem:[#allocation7 + $0x68] sm:$0xff]  ;;  %s499_s2 = smov 32   ;;  %vm159_vm8 = vcmask 261120  }
  0x14   :  { %s330_s12 = sld [smem:[#allocation2 + $0x1]]  ;;  %188 = vmatpush.msra.mxu0 %v183_v0  ;;  %339 = vmatpush.msra.mxu1 %v183_v0  ;;  %v553_v3 = vld [vmem:[#allocation6] sm:$0xff]  ;;  %v555_v4 = vld [vmem:[#allocation6 + $0x8] sm:$0xff]  ;;  %v180_v5 = vld [vmem:[#allocation7 + $0x60] sm:$0xff]  ;;  %s500_s13 = smov 64   ;;  %vm162_vm9 = vcmask 523264  }
  0x15   :  { %v179_v7 = vld [vmem:[#allocation7 + $0x58] sm:$0xff]  ;;  %v178_v11 = vld [vmem:[#allocation7 + $0x50] sm:$0xff]  ;;  %v177_v14 = vld [vmem:[#allocation7 + $0x48] sm:$0xff]  ;;  %s501_s14 = smov 96   ;;  %v333_v36 = vmul.f32 -1.442695, %v553_v3 }
  0x16   :  { %189 = vmatpush.msra.mxu0 %v182_v1  ;;  %340 = vmatpush.msra.mxu1 %v182_v1  ;;  %v176_v17 = vld [vmem:[#allocation7 + $0x40] sm:$0xff]  ;;  %v175_v21 = vld [vmem:[#allocation7 + $0x38] sm:$0xff]  ;;  %v334_v37 = vmul.f32 -1.442695, %v555_v4  ;;  %v174_v40 = vld [vmem:[#allocation7 + $0x30] sm:$0xff]  ;;  %vm165_vm10 = vcmask 785408  }
  0x17   :  { %382 = vpow2.f32 %v333_v36  ;;  %v173_v41 = vld [vmem:[#allocation7 + $0x28] sm:$0xff]  ;;  %v172_v43 = vld [vmem:[#allocation7 + $0x20] sm:$0xff]  ;;  %v171_v45 = vld [vmem:[#allocation7 + $0x18] sm:$0xff]  ;;  %s315_s22 = sshll.u32 %s584_s6, 4  ;;  %s316_s22 = int_to_ptr.hbm [resolvable:$true] %s315_s22 }
  0x18   :  { %190 = vmatpush.msra.mxu0 %v181_v2  ;;  %341 = vmatpush.msra.mxu1 %v181_v2  ;;  %384 = vpow2.f32 %v334_v37  ;;  %v170_v46 = vld [vmem:[#allocation7 + $0x10] sm:$0xff]  ;;  %v169_v47 = vld [vmem:[#allocation7 + $0x8] sm:$0xff]  ;;  %v168_v48 = vld [vmem:[#allocation7] sm:$0xff] }
  0x19   :  { %v73_v6 = vstv %s71_s1 }
  0x1a   :  { %v74_v8 = vsub.f32 %v553_v3, %v73_v6  ;;  %v75_v9 = vsub.f32 %v555_v4, %v73_v6  ;;  %v76_v10 = vstv %s330_s12  ;;  %191 = vmatpush.msra.mxu0 %v180_v5  ;;  %342 = vmatpush.msra.mxu1 %v180_v5 }
  0x1c   :  { %v77_v12 = vmul.f32 %v76_v10, %v74_v8  ;;  %v78_v13 = vmul.f32 %v76_v10, %v75_v9  ;;  %192 = vmatpush.msra.mxu0 %v179_v7  ;;  %343 = vmatpush.msra.mxu1 %v179_v7 }
  0x1d   :  { %v383_v38 = vpop.eup %382 }
  0x1e   :  { %v331_v15 = vadd.f32 -1.0, %v77_v12  ;;  %v332_v16 = vadd.f32 -1.0, %v78_v13  ;;  %193 = vmatpush.msra.mxu0 %v178_v11  ;;  %344 = vmatpush.msra.mxu1 %v178_v11  ;;  %v385_v39 = vpop.eup %384  ;;  %v87_v42 = vadd.f32 1.0, %v383_v38 }
  0x1f   :  { %v88_v44 = vadd.f32 1.0, %v385_v39 }
  0x20   :  { %v364_v18 = vpack.i.bf16 %v332_v16, %v331_v15  ;;  %v121_v19 = vmul.f32 1.5, %v331_v15  ;;  %v122_v20 = vmul.f32 1.5, %v332_v16  ;;  %194 = vmatpush.msra.mxu0 %v177_v14  ;;  %345 = vmatpush.msra.mxu1 %v177_v14  ;;  %v127_v24 = vmul.f32 1.6666666, %v331_v15 }
  0x21   :  { %v128_v25 = vmul.f32 1.6666666, %v332_v16  ;;  %v131_v28 = vmul.f32 0.6666667, %v331_v15  ;;  %v132_v29 = vmul.f32 0.6666667, %v332_v16  ;;  %386 = vrcp.f32 %v87_v42 }
  0x22   :  { %365 = vrot.lane.b32.xlu0 %v364_v18, %s499_s2  ;;  %v123_v22 = vmul.f32 %v331_v15, %v121_v19  ;;  %v124_v23 = vmul.f32 %v332_v16, %v122_v20  ;;  %195 = vmatpush.msra.mxu0 %v176_v17  ;;  %388 = vrcp.f32 %v88_v44  ;;  %vm94_vm0 = vweird.f32 %v87_v42 }
  0x23   :  { %346 = vmatpush.msra.mxu1 %v176_v17  ;;  %vm109_vm2 = vweird.f32 %v88_v44  ;;  %v100_v57 = vand.u32 2147483648, %v87_v42  ;;  %v115_v58 = vand.u32 2147483648, %v88_v44  ;;  %v98_v60 = vand.u32 2147483647, %v87_v42 }
  0x24   :  { %v335_v26 = vadd.f32 -0.5, %v123_v22  ;;  %v336_v27 = vadd.f32 -0.5, %v124_v23  ;;  %196 = vmatpush.msra.mxu0 %v175_v21  ;;  %v113_v62 = vand.u32 2147483647, %v88_v44 }
  0x25   :  { %347 = vmatpush.msra.mxu1 %v175_v21  ;;  %v101_v63 = vor.u32 1.1754944e-38, %v100_v57  ;;  %v116_v0 = vor.u32 1.1754944e-38, %v115_v58  ;;  %vm99_vm6 = vcmp.eq.f32.partialorder %v98_v60, 8.507059e+37  ;;  %v381_v58 = vld [vmem:[%s583_s5] ss:$0 sm:$0xff] }
  0x26   :  { %v369_v30 = vpack.i.bf16 %v336_v27, %v335_v26  ;;  %v129_v31 = vmul.f32 %v335_v26, %v127_v24  ;;  %v130_v32 = vmul.f32 %v336_v27, %v128_v25  ;;  %197 = vmatpush.msra.mxu0 %v174_v40  ;;  %vm114_vm7 = vcmp.eq.f32.partialorder %v113_v62, 8.507059e+37 }
  0x27   :  { %348 = vmatpush.msra.mxu1 %v174_v40  ;;  %v387_v49 = vpop.eup %386 }
  0x28   :  { %v133_v33 = vsub.f32 %v129_v31, %v131_v28  ;;  %v134_v34 = vsub.f32 %v130_v32, %v132_v29  ;;  %198 = vmatpush.msra.mxu0 %v173_v41  ;;  %v389_v50 = vpop.eup %388  ;;  %v90_v51 = vmul.f32 %v387_v49, %v87_v42  ;;  %vm95_vm1 = vweird.f32 %v387_v49 }
  0x29   :  { %349 = vmatpush.msra.mxu1 %v173_v41  ;;  %v105_v52 = vmul.f32 %v389_v50, %v88_v44  ;;  %vm110_vm3 = vweird.f32 %v389_v50  ;;  %vm96_vm4 = vmor %vm94_vm0, %vm95_vm1 }
  0x2a   :  { %370 = vrot.lane.b32.xlu0 %v369_v30, %s500_s13  ;;  %v374_v35 = vpack.i.bf16 %v134_v34, %v133_v33  ;;  %199 = vmatpush.msra.mxu0 %v172_v43  ;;  %v91_v53 = vsub.f32 1.0, %v90_v51  ;;  %vm111_vm5 = vmor %vm109_vm2, %vm110_vm3 }
  0x2b   :  { %350 = vmatpush.msra.mxu1 %v172_v43  ;;  %v106_v54 = vsub.f32 1.0, %v105_v52 }
  0x2c   :  { %375 = vrot.lane.b32.xlu1 %v374_v35, %s501_s14  ;;  %200 = vmatpush.msra.mxu0 %v171_v45  ;;  %v92_v55 = vmul.f32 %v387_v49, %v91_v53 }
  0x2d   :  { %351 = vmatpush.msra.mxu1 %v171_v45  ;;  %v107_v56 = vmul.f32 %v389_v50, %v106_v54  ;;  %v380_v54 = vld [vmem:[%s582_s4] ss:$0 sm:$0xff]  ;;  %s502_s4 = smov [#allocation9]  }
  0x2e   :  { %201 = vmatpush.msra.mxu0 %v170_v46  ;;  %v93_v59 = vadd.f32 %v387_v49, %v92_v55  ;;  %s313_s5 = sshll.u32 %s502_s4, 4  ;;  %s314_s5 = int_to_ptr.vmem [resolvable:$true] %s313_s5 }
  0x2f   :  { %352 = vmatpush.msra.mxu1 %v170_v46  ;;  %v108_v61 = vadd.f32 %v389_v50, %v107_v56 }
  0x30   :  { %202 = vmatpush.msra.mxu0 %v169_v47  ;;  %v97_v2 = vsel %vm96_vm4, %v387_v49, %v93_v59 }
  0x31   :  { %353 = vmatpush.msra.mxu1 %v169_v47  ;;  %v112_v5 = vsel %vm111_vm5, %v389_v50, %v108_v61  ;;  %v102_v6 = vsel %vm99_vm6, %v101_v63, %v97_v2 }
  0x32   :  { %203 = vmatpush.msra.mxu0 %v168_v48  ;;  %v117_v7 = vsel %vm114_vm7, %v116_v0, %v112_v5  ;;  %v119_v10 = vmul.f32 %v102_v6, %v553_v3  ;;  %v379_v3 = vld [vmem:[%s581_s3] ss:$0 sm:$0xff] }
  0x33   :  { %354 = vmatpush.msra.mxu1 %v168_v48  ;;  %v120_v11 = vmul.f32 %v117_v7, %v555_v4 }
  0x94   :  { %v366_v1 = vpop.permute.xlu0 %365 }
  0x95   :  { %v368_v8 = vunpack.i.h.bf16 %v366_v1  ;;  %v367_v9 = vunpack.i.l.bf16 %v366_v1 }
  0x97   :  { %v160_v16 = vsel %vm159_vm8, %v119_v10, %v367_v9  ;;  %v161_v17 = vsel %vm159_vm8, %v120_v11, %v368_v8 }
  0x9c   :  { %v371_v12 = vpop.permute.xlu0 %370 }
  0x9d   :  { %v373_v13 = vunpack.i.h.bf16 %v371_v12  ;;  %v372_v14 = vunpack.i.l.bf16 %v371_v12 }
  0x9e   :  { %v376_v15 = vpop.permute.xlu1 %375 }
  0x9f   :  { %v378_v18 = vunpack.i.h.bf16 %v376_v15  ;;  %v377_v19 = vunpack.i.l.bf16 %v376_v15  ;;  %v163_v20 = vsel %vm162_vm9, %v160_v16, %v372_v14  ;;  %v164_v21 = vsel %vm162_vm9, %v161_v17, %v373_v13 }
  0xa1   :  { %v166_v22 = vsel %vm165_vm10, %v163_v20, %v377_v19  ;;  %v167_v23 = vsel %vm165_vm10, %v164_v21, %v378_v18 }
  0xa2   :  { %204 = vmatmul.f32.vlgmr.msra.gmra.mxu0 %v166_v22  ;;  %207 = vmatmul.f32.vlgmr.msra.gmra.mxu1 %v167_v23 }
 0x11f   :  { %v205_v4 = vpop.f32.mrf.mxu0  ;;  %v208_v24 = vpop.f32.mrf.mxu1 }
 0x120   :  { %v206_v25 = vadd.f32 %v379_v3, %v205_v4  ;;  %v209_v26 = vadd.f32 %v379_v3, %v208_v24 }
 0x122   :  { %213 = vadd.xlane.f32.xlu2 %v209_v26  ;;  %211 = vadd.xlane.f32.xlu1 %v206_v25  ;;  %v218_v27 = vmul.f32 %v209_v26, %v209_v26  ;;  %v217_v28 = vmul.f32 %v206_v25, %v206_v25 }
 0x124   :  { %221 = vadd.xlane.f32.xlu0 %v218_v27 }
 0x12a   :  { %219 = vadd.xlane.f32.xlu2 %v217_v28 }
 0x195   :  { %v214_v29 = vpop.xlane.xlu2 %213  ;;  %v212_v31 = vpop.xlane.xlu1 %211 }
 0x196   :  { %v216_v30 = vmul.f32 0.015625, %v214_v29  ;;  %v215_v35 = vmul.f32 0.015625, %v212_v31 }
 0x197   :  { %v222_v32 = vpop.xlane.xlu0 %221 }
 0x198   :  { %v226_v33 = vmul.f32 %v216_v30, %v216_v30  ;;  %v224_v34 = vmul.f32 0.015625, %v222_v32  ;;  %v225_v39 = vmul.f32 %v215_v35, %v215_v35  ;;  %v230_v52 = vsub.f32 %v209_v26, %v216_v30 }
 0x199   :  { %v229_v61 = vsub.f32 %v206_v25, %v215_v35 }
 0x19a   :  { %v228_v36 = vsub.f32 %v224_v34, %v226_v33 }
 0x19c   :  { %v232_v37 = vadd.f32 1e-05, %v228_v36 }
 0x19d   :  { %v220_v38 = vpop.xlane.xlu2 %219 }
 0x19e   :  { %v223_v40 = vmul.f32 0.015625, %v220_v38  ;;  %390 = vrsqrt.f32 %v232_v37  ;;  %vm249_vm12 = vweird.f32 %v232_v37 }
 0x1a0   :  { %v227_v41 = vsub.f32 %v223_v40, %v225_v39 }
 0x1a2   :  { %v231_v42 = vadd.f32 1e-05, %v227_v41 }
 0x1a4   :  { %392 = vrsqrt.f32 %v231_v42  ;;  %v391_v43 = vpop.eup %390  ;;  %vm239_vm15 = vweird.f32 %v231_v42 }
 0x1a5   :  { %v244_v44 = vmul.f32 %v391_v43, %v232_v37  ;;  %vm250_vm11 = vweird.f32 %v391_v43 }
 0x1a6   :  { %vm251_vm13 = vmor %vm249_vm12, %vm250_vm11 }
 0x1a7   :  { %v245_v45 = vmul.f32 %v391_v43, %v244_v44 }
 0x1a9   :  { %v246_v47 = vmul.f32 0.5, %v245_v45 }
 0x1aa   :  { %v393_v46 = vpop.eup %392 }
 0x1ab   :  { %v234_v48 = vmul.f32 %v393_v46, %v231_v42  ;;  %v247_v49 = vsub.f32 1.5, %v246_v47  ;;  %vm240_vm14 = vweird.f32 %v393_v46 }
 0x1ac   :  { %vm241_vm0 = vmor %vm239_vm15, %vm240_vm14 }
 0x1ad   :  { %v235_v50 = vmul.f32 %v393_v46, %v234_v48  ;;  %v248_v51 = vmul.f32 %v391_v43, %v247_v49 }
 0x1af   :  { %v236_v53 = vmul.f32 0.5, %v235_v50  ;;  %v252_v55 = vsel %vm251_vm13, %v391_v43, %v248_v51 }
 0x1b0   :  { %v254_v57 = vmul.f32 %v252_v55, %v230_v52 }
 0x1b1   :  { %v237_v56 = vsub.f32 1.5, %v236_v53 }
 0x1b2   :  { %v260_v60 = vmul.f32 %v380_v54, %v254_v57 }
 0x1b3   :  { %v238_v59 = vmul.f32 %v393_v46, %v237_v56 }
 0x1b4   :  { %v266_v63 = vadd.f32 %v381_v58, %v260_v60 }
 0x1b5   :  { %v242_v62 = vsel %vm241_vm0, %v393_v46, %v238_v59 }
 0x1b6   :  { %v253_v0 = vmul.f32 %v242_v62, %v229_v61  ;;  %v338_v1 = vmul.f32 -1.442695, %v266_v63 }
 0x1b8   :  { %v259_v2 = vmul.f32 %v380_v54, %v253_v0  ;;  %394 = vpow2.f32 %v338_v1 }
 0x1ba   :  { %v265_v5 = vadd.f32 %v381_v58, %v259_v2 }
 0x1bc   :  { %v337_v6 = vmul.f32 -1.442695, %v265_v5 }
 0x1be   :  { %396 = vpow2.f32 %v337_v6  ;;  %v395_v7 = vpop.eup %394 }
 0x1bf   :  { %v274_v8 = vadd.f32 1.0, %v395_v7 }
 0x1c1   :  { %398 = vrcp.f32 %v274_v8  ;;  %v301_v14 = vand.u32 2147483648, %v274_v8  ;;  %v299_v17 = vand.u32 2147483647, %v274_v8  ;;  %vm295_vm2 = vweird.f32 %v274_v8 }
 0x1c3   :  { %v302_v21 = vor.u32 1.1754944e-38, %v301_v14  ;;  %vm300_vm4 = vcmp.eq.f32.partialorder %v299_v17, 8.507059e+37 }
 0x1c4   :  { %v397_v9 = vpop.eup %396 }
 0x1c5   :  { %v273_v10 = vadd.f32 1.0, %v397_v9 }
 0x1c7   :  { %400 = vrcp.f32 %v273_v10  ;;  %v399_v11 = vpop.eup %398  ;;  %v286_v22 = vand.u32 2147483648, %v273_v10  ;;  %v284_v4 = vand.u32 2147483647, %v273_v10  ;;  %vm280_vm6 = vweird.f32 %v273_v10 }
 0x1c8   :  { %v291_v12 = vmul.f32 %v399_v11, %v274_v8  ;;  %vm296_vm1 = vweird.f32 %v399_v11 }
 0x1c9   :  { %vm297_vm3 = vmor %vm295_vm2, %vm296_vm1  ;;  %v287_v27 = vor.u32 1.1754944e-38, %v286_v22  ;;  %vm285_vm8 = vcmp.eq.f32.partialorder %v284_v4, 8.507059e+37 }
 0x1ca   :  { %v292_v13 = vsub.f32 1.0, %v291_v12 }
 0x1cc   :  { %v293_v16 = vmul.f32 %v399_v11, %v292_v13 }
 0x1cd   :  { %v401_v15 = vpop.eup %400 }
 0x1ce   :  { %v276_v18 = vmul.f32 %v401_v15, %v273_v10  ;;  %v294_v19 = vadd.f32 %v399_v11, %v293_v16  ;;  %vm281_vm5 = vweird.f32 %v401_v15 }
 0x1cf   :  { %vm282_vm7 = vmor %vm280_vm6, %vm281_vm5 }
 0x1d0   :  { %v277_v20 = vsub.f32 1.0, %v276_v18  ;;  %v298_v23 = vsel %vm297_vm3, %v399_v11, %v294_v19 }
 0x1d1   :  { %v303_v24 = vsel %vm300_vm4, %v302_v21, %v298_v23 }
 0x1d2   :  { %v278_v3 = vmul.f32 %v401_v15, %v277_v20  ;;  %v306_v25 = vmul.f32 %v303_v24, %v266_v63 }
 0x1d4   :  { %v279_v26 = vadd.f32 %v401_v15, %v278_v3  ;;  %308 = vst [vmem:[#allocation9 + $0x8] sm:$0xff] %v306_v25 }
 0x1d6   :  { %v283_v28 = vsel %vm282_vm7, %v401_v15, %v279_v26 }
 0x1d7   :  { %v288_v29 = vsel %vm285_vm8, %v287_v27, %v283_v28 }
 0x1d8   :  { %v305_v30 = vmul.f32 %v288_v29, %v265_v5 }
 0x1da   :  { %307 = vst [vmem:[#allocation9] sm:$0xff] %v305_v30 }
 0x1db   :  { %321 = dma.vmem_to_hbm [thread:$0]  %s314_s5, 256, %s316_s22, [#allocation4], %s496_s30, %s496_s30, %s497_s7  }
 0x1dc   :  { %492 = dma.done.wait [#allocation4], 256  }
 0x1dd   :  { %493 = vsyncadd [#allocation4], 4294967040 }
 0x1de   :  { %326 = vsyncpa [#allocation3], 1 }
 0x1df   :  { %327 = vsyncpa [#allocation8], 1 }
 0x1e0   :  { %328 = vsyncpa [#allocation4], 1 }
 0x1e1   :  { %329 = vsyncpa [#allocation5], 1 }

</bundles_post_ra>
